<compile_context>
chip_gen: v7x
topology: tpu7x:2x2x1
jax: 0.10.0
libtpu: 0.0.40
codegen_flags: <defaults>
</compile_context>

<pallas_src>
import functools

import jax
import jax.numpy as jnp
from jax.experimental import pallas as pl
from jax.experimental.pallas import tpu as pltpu


def _round_up(x, m):
    return ((x + m - 1) // m) * m


# ------------------------------------------------------------------ kernel ---
def _fused_mlp_kernel(inv_sigma_ref, x_ref, *refs, n_layers, alpha):
    """Fused [SN(Linear) + ELU(alpha)] * (n_layers-1) + SN(Linear).

    refs = (w0, b0, w1, b1, ..., w_{L-1}, b_{L-1}, o_ref).
    Weights are (in, out); spectral norm is a per-layer scalar multiply by
    1/sigma read from SMEM.  The running activation `h` never leaves VMEM.
    The per-layer Python loop is unrolled at trace time (static n_layers).
    """
    o_ref = refs[-1]
    h = x_ref[...].astype(jnp.float32)
    for l in range(n_layers):
        w = refs[2 * l][...]
        b = refs[2 * l + 1][...]
        inv_sigma = inv_sigma_ref[l]
        y = jnp.dot(h, w, preferred_element_type=jnp.float32)
        y = y * inv_sigma + b  # SN scale + bias: VPU work hidden under the MXU
        if l < n_layers - 1:
            # torch.nn.ELU(alpha): x if x > 0 else alpha*(exp(x)-1).
            # Clamp the exp argument so the discarded branch cannot overflow.
            y = jnp.where(y > 0, y, alpha * (jnp.exp(jnp.minimum(y, 0.0)) - 1.0))
        h = y
    o_ref[...] = h.astype(o_ref.dtype)


# ---------------------------------------------------------- spectral norm ----
def _l2normalize(v, eps=1e-12):
    return v / (jnp.linalg.norm(v) + eps)


def _spectral_sigma(w_bar_t, u):
    """One power iteration (classic SN-GAN SpectralNorm forward).

    w_bar_t: (in, out) pre-transposed weight; u: (out,).
    Returns (sigma, u_new).  Tiny mat-vec glue; stays in plain JAX.
    """
    v = _l2normalize(w_bar_t @ u)   # (in,)
    wv = v @ w_bar_t                # (out,)  == w_bar @ v
    u_new = _l2normalize(wv)
    sigma = u_new @ wv
    return sigma, u_new


# ------------------------------------------------------------------- model ---
def init_mlp_d_params(key, input_size, n_hidden, hidden_size, output_size):
    """PyTorch-Linear-style init.  Weights stored PRE-TRANSPOSED as w_bar_t
    (in, out) so the forward pass never transposes on the host graph."""
    params = []
    in_sz = input_size
    sizes = [hidden_size] * n_hidden + [output_size]
    for out_sz in sizes:
        key, kw, kb, ku = jax.random.split(key, 4)
        bound = 1.0 / float(in_sz) ** 0.5
        w = jax.random.uniform(kw, (out_sz, in_sz), jnp.float32, -bound, bound)
        b = jax.random.uniform(kb, (out_sz,), jnp.float32, -bound, bound)
        u = _l2normalize(jax.random.normal(ku, (out_sz,), jnp.float32))
        params.append({"w_bar_t": w.T, "b": b, "u": u})
        in_sz = out_sz
    return params


@functools.partial(jax.jit, static_argnames=("alpha",))
def mlp_d_forward(params, x, *, alpha=0.2):
    """Forward pass of MLP_d: [SN(Linear) + ELU(0.2)] * n_hidden + SN(Linear)."""
    n_layers = len(params)
    M, in_size = x.shape
    out_size = params[-1]["w_bar_t"].shape[1]
    n_pad = max(_round_up(out_size, 128), 128)  # lane-dense final store

    # ---- tiny spectral-norm glue (power iteration) in plain JAX ------------
    inv_sigma = jnp.stack(
        [1.0 / _spectral_sigma(p["w_bar_t"], p["u"])[0] for p in params]
    ).astype(jnp.float32)

    # ---- kernel operands: pre-transposed weights, last layer lane-padded ---
    operands = []
    flops = 0
    for li, p in enumerate(params):
        w_t = p["w_bar_t"]
        b = p["b"].reshape(1, -1)
        if li == n_layers - 1 and n_pad != w_t.shape[1]:
            pad = n_pad - w_t.shape[1]
            w_t = jnp.pad(w_t, ((0, 0), (0, pad)))
            b = jnp.pad(b, ((0, 0), (0, pad)))
        operands += [w_t, b]
        flops += 2 * M * w_t.shape[0] * w_t.shape[1]

    # ---- batch tiling: grid over M, weights resident across grid steps -----
    tm = M
    for cand in (512, 256, 128):
        if M % cand == 0:
            tm = cand
            break
    grid = (M // tm,)

    in_specs = [
        pl.BlockSpec(memory_space=pltpu.MemorySpace.SMEM),      # inv_sigma (L,)
        pl.BlockSpec((tm, in_size), lambda i: (i, 0)),          # activations
    ]
    for li in range(n_layers):
        k, n = operands[2 * li].shape
        in_specs.append(pl.BlockSpec((k, n), lambda i: (0, 0)))  # weight: resident
        in_specs.append(pl.BlockSpec((1, n), lambda i: (0, 0)))  # bias:   resident
    out_specs = pl.BlockSpec((tm, n_pad), lambda i: (i, 0))

    hidden_feats = sum(p["w_bar_t"].shape[1] for p in params[:-1])
    bytes_accessed = (
        int(x.size) * x.dtype.itemsize
        + sum(int(o.size) * o.dtype.itemsize for o in operands)
        + M * n_pad * x.dtype.itemsize
    )
    cost = pl.CostEstimate(
        flops=int(flops),
        transcendentals=int(M * hidden_feats),
        bytes_accessed=int(bytes_accessed),
    )

    out = pl.pallas_call(
        functools.partial(_fused_mlp_kernel, n_layers=n_layers, alpha=alpha),
        out_shape=jax.ShapeDtypeStruct((M, n_pad), x.dtype),
        grid_spec=pltpu.PrefetchScalarGridSpec(
            num_scalar_prefetch=0,
            grid=grid,
            in_specs=in_specs,
            out_specs=out_specs,
        ),
        compiler_params=pltpu.CompilerParams(
            dimension_semantics=("parallel",),
            vmem_limit_bytes=32 * 1024 * 1024,
        ),
        cost_estimate=cost,
    )(inv_sigma, x, *operands)

    return out[:, :out_size]


# -------------------------------------------------------------------- main ---
if __name__ == "__main__":
    input_size, n_hidden, hidden_size, output_size = 16, 2, 32, 4
    batch = 8

    key = jax.random.PRNGKey(0)
    k_params, k_x = jax.random.split(key)
    params = init_mlp_d_params(k_params, input_size, n_hidden,
                               hidden_size, output_size)
    x = jax.random.normal(k_x, (batch, input_size), jnp.float32)

    out = mlp_d_forward(params, x)
    jax.block_until_ready(out)

    # Pure-JAX reference of the same forward semantics (PyTorch layout).
    def ref_forward(params, x, alpha=0.2):
        h = x
        for idx, p in enumerate(params):
            w_bar = p["w_bar_t"].T             # (out, in)
            u = p["u"]
            v = _l2normalize(w_bar.T @ u)
            u_new = _l2normalize(w_bar @ v)
            sigma = u_new @ (w_bar @ v)
            h = h @ (w_bar / sigma).T + p["b"]
            if idx != len(params) - 1:
                h = jnp.where(h > 0, h, alpha * (jnp.exp(h) - 1.0))
        return h

    ref = ref_forward(params, x)
    assert out.shape == (batch, output_size)
    assert jnp.allclose(out, ref, atol=1e-5, rtol=1e-5), \
        float(jnp.max(jnp.abs(out - ref)))

    print("KERNEL_OK")
</pallas_src>

<mosaic_0001>
module attributes {stable_mosaic.version = 11 : i64} {
  func.func @_fused_mlp_kernel(%arg0: i32, %arg1: memref<3xf32, #tpu.memory_space<smem>>, %arg2: memref<8x16xf32, #tpu.memory_space<vmem>>, %arg3: memref<16x32xf32, #tpu.memory_space<vmem>>, %arg4: memref<1x32xf32, #tpu.memory_space<vmem>>, %arg5: memref<32x32xf32, #tpu.memory_space<vmem>>, %arg6: memref<1x32xf32, #tpu.memory_space<vmem>>, %arg7: memref<32x128xf32, #tpu.memory_space<vmem>>, %arg8: memref<1x128xf32, #tpu.memory_space<vmem>>, %arg9: memref<8x128xf32, #tpu.memory_space<vmem>>) attributes {dimension_semantics = [#tpu.dimension_semantics<parallel>], iteration_bounds = array<i64: 1>, scalar_prefetch = 0 : i64, scratch_operands = 0 : i64, tpu.core_type = #tpu.core_type<tc>, window_params = [{transform_indices = @transform_0, window_bounds = array<i64: 3>}, {transform_indices = @transform_1, window_bounds = array<i64: 8, 16>}, {pipeline_mode = #tpu.pipeline_mode<synchronous>, transform_indices = @transform_2, window_bounds = array<i64: 16, 32>}, {pipeline_mode = #tpu.pipeline_mode<synchronous>, transform_indices = @transform_3, window_bounds = array<i64: 1, 32>}, {pipeline_mode = #tpu.pipeline_mode<synchronous>, transform_indices = @transform_4, window_bounds = array<i64: 32, 32>}, {pipeline_mode = #tpu.pipeline_mode<synchronous>, transform_indices = @transform_5, window_bounds = array<i64: 1, 32>}, {pipeline_mode = #tpu.pipeline_mode<synchronous>, transform_indices = @transform_6, window_bounds = array<i64: 32, 128>}, {pipeline_mode = #tpu.pipeline_mode<synchronous>, transform_indices = @transform_7, window_bounds = array<i64: 1, 128>}, {transform_indices = @transform_8, window_bounds = array<i64: 8, 128>}]} {
    %c0 = arith.constant 0 : index
    %c0_0 = arith.constant 0 : index
    %0 = vector.load %arg2[%c0, %c0_0] : memref<8x16xf32, #tpu.memory_space<vmem>>, vector<8x16xf32>
    %c0_1 = arith.constant 0 : index
    %c0_2 = arith.constant 0 : index
    %1 = vector.load %arg3[%c0_1, %c0_2] : memref<16x32xf32, #tpu.memory_space<vmem>>, vector<16x32xf32>
    %c0_3 = arith.constant 0 : index
    %c0_4 = arith.constant 0 : index
    %2 = vector.load %arg4[%c0_3, %c0_4] : memref<1x32xf32, #tpu.memory_space<vmem>>, vector<1x32xf32>
    %c0_5 = arith.constant 0 : index
    %3 = memref.load %arg1[%c0_5] : memref<3xf32, #tpu.memory_space<smem>>
    %cst = arith.constant dense<0.000000e+00> : vector<8x32xf32>
    %4 = tpu.matmul %0, %1, %cst {dimension_numbers = #tpu.dot_dimension_numbers<[1], [0], [0], [1], [0, 0, 1, 1], [], []>} : vector<8x16xf32>, vector<16x32xf32>, vector<8x32xf32> -> vector<8x32xf32>
    %5 = vector.broadcast %3 : f32 to vector<8x32xf32>
    %6 = arith.mulf %4, %5 : vector<8x32xf32>
    %7 = vector.broadcast %2 : vector<1x32xf32> to vector<8x32xf32>
    %8 = arith.addf %6, %7 : vector<8x32xf32>
    %cst_6 = arith.constant 0.000000e+00 : f32
    %9 = vector.broadcast %cst_6 : f32 to vector<8x32xf32>
    %10 = arith.cmpf ogt, %8, %9 : vector<8x32xf32>
    %cst_7 = arith.constant 0.000000e+00 : f32
    %11 = vector.broadcast %cst_7 : f32 to vector<8x32xf32>
    %12 = arith.minimumf %8, %11 : vector<8x32xf32>
    %13 = math.exp %12 : vector<8x32xf32>
    %cst_8 = arith.constant 1.000000e+00 : f32
    %14 = vector.broadcast %cst_8 : f32 to vector<8x32xf32>
    %15 = arith.subf %13, %14 : vector<8x32xf32>
    %cst_9 = arith.constant 2.000000e-01 : f32
    %16 = vector.broadcast %cst_9 : f32 to vector<8x32xf32>
    %17 = arith.mulf %16, %15 : vector<8x32xf32>
    %18 = arith.select %10, %8, %17 : vector<8x32xi1>, vector<8x32xf32>
    %c0_10 = arith.constant 0 : index
    %c0_11 = arith.constant 0 : index
    %19 = vector.load %arg5[%c0_10, %c0_11] : memref<32x32xf32, #tpu.memory_space<vmem>>, vector<32x32xf32>
    %c0_12 = arith.constant 0 : index
    %c0_13 = arith.constant 0 : index
    %20 = vector.load %arg6[%c0_12, %c0_13] : memref<1x32xf32, #tpu.memory_space<vmem>>, vector<1x32xf32>
    %c1 = arith.constant 1 : index
    %21 = memref.load %arg1[%c1] : memref<3xf32, #tpu.memory_space<smem>>
    %cst_14 = arith.constant dense<0.000000e+00> : vector<8x32xf32>
    %22 = tpu.matmul %18, %19, %cst_14 {dimension_numbers = #tpu.dot_dimension_numbers<[1], [0], [0], [1], [0, 0, 1, 1], [], []>} : vector<8x32xf32>, vector<32x32xf32>, vector<8x32xf32> -> vector<8x32xf32>
    %23 = vector.broadcast %21 : f32 to vector<8x32xf32>
    %24 = arith.mulf %22, %23 : vector<8x32xf32>
    %25 = vector.broadcast %20 : vector<1x32xf32> to vector<8x32xf32>
    %26 = arith.addf %24, %25 : vector<8x32xf32>
    %cst_15 = arith.constant 0.000000e+00 : f32
    %27 = vector.broadcast %cst_15 : f32 to vector<8x32xf32>
    %28 = arith.cmpf ogt, %26, %27 : vector<8x32xf32>
    %cst_16 = arith.constant 0.000000e+00 : f32
    %29 = vector.broadcast %cst_16 : f32 to vector<8x32xf32>
    %30 = arith.minimumf %26, %29 : vector<8x32xf32>
    %31 = math.exp %30 : vector<8x32xf32>
    %cst_17 = arith.constant 1.000000e+00 : f32
    %32 = vector.broadcast %cst_17 : f32 to vector<8x32xf32>
    %33 = arith.subf %31, %32 : vector<8x32xf32>
    %cst_18 = arith.constant 2.000000e-01 : f32
    %34 = vector.broadcast %cst_18 : f32 to vector<8x32xf32>
    %35 = arith.mulf %34, %33 : vector<8x32xf32>
    %36 = arith.select %28, %26, %35 : vector<8x32xi1>, vector<8x32xf32>
    %c0_19 = arith.constant 0 : index
    %c0_20 = arith.constant 0 : index
    %37 = vector.load %arg7[%c0_19, %c0_20] : memref<32x128xf32, #tpu.memory_space<vmem>>, vector<32x128xf32>
    %c0_21 = arith.constant 0 : index
    %c0_22 = arith.constant 0 : index
    %38 = vector.load %arg8[%c0_21, %c0_22] : memref<1x128xf32, #tpu.memory_space<vmem>>, vector<1x128xf32>
    %c2 = arith.constant 2 : index
    %39 = memref.load %arg1[%c2] : memref<3xf32, #tpu.memory_space<smem>>
    %cst_23 = arith.constant dense<0.000000e+00> : vector<8x128xf32>
    %40 = tpu.matmul %36, %37, %cst_23 {dimension_numbers = #tpu.dot_dimension_numbers<[1], [0], [0], [1], [0, 0, 1, 1], [], []>} : vector<8x32xf32>, vector<32x128xf32>, vector<8x128xf32> -> vector<8x128xf32>
    %41 = vector.broadcast %39 : f32 to vector<8x128xf32>
    %42 = arith.mulf %40, %41 : vector<8x128xf32>
    %43 = vector.broadcast %38 : vector<1x128xf32> to vector<8x128xf32>
    %44 = arith.addf %42, %43 : vector<8x128xf32>
    %c0_24 = arith.constant 0 : index
    %c0_25 = arith.constant 0 : index
    %45 = vector.load %arg9[%c0_24, %c0_25] : memref<8x128xf32, #tpu.memory_space<vmem>>, vector<8x128xf32>
    tpu.vector_store %arg9[%c0_24, %c0_25], %44 {strides = array<i32>} : memref<8x128xf32, #tpu.memory_space<vmem>>, vector<8x128xf32>,
    return
  }
  func.func @transform_0(%arg0: i32) -> i32 {
    %c0_i32 = arith.constant 0 : i32
    %c0_i32_0 = arith.constant 0 : i32
    return %c0_i32 : i32
  }
  func.func @transform_1(%arg0: i32) -> (i32, i32) {
    %c0_i32 = arith.constant 0 : i32
    %c0_i32_0 = arith.constant 0 : i32
    return %arg0, %c0_i32 : i32, i32
  }
  func.func @transform_2(%arg0: i32) -> (i32, i32) {
    %c0_i32 = arith.constant 0 : i32
    %c0_i32_0 = arith.constant 0 : i32
    %c0_i32_1 = arith.constant 0 : i32
    return %c0_i32, %c0_i32_0 : i32, i32
  }
  func.func @transform_3(%arg0: i32) -> (i32, i32) {
    %c0_i32 = arith.constant 0 : i32
    %c0_i32_0 = arith.constant 0 : i32
    %c0_i32_1 = arith.constant 0 : i32
    return %c0_i32, %c0_i32_0 : i32, i32
  }
  func.func @transform_4(%arg0: i32) -> (i32, i32) {
    %c0_i32 = arith.constant 0 : i32
    %c0_i32_0 = arith.constant 0 : i32
    %c0_i32_1 = arith.constant 0 : i32
    return %c0_i32, %c0_i32_0 : i32, i32
  }
  func.func @transform_5(%arg0: i32) -> (i32, i32) {
    %c0_i32 = arith.constant 0 : i32
    %c0_i32_0 = arith.constant 0 : i32
    %c0_i32_1 = arith.constant 0 : i32
    return %c0_i32, %c0_i32_0 : i32, i32
  }
  func.func @transform_6(%arg0: i32) -> (i32, i32) {
    %c0_i32 = arith.constant 0 : i32
    %c0_i32_0 = arith.constant 0 : i32
    %c0_i32_1 = arith.constant 0 : i32
    return %c0_i32, %c0_i32_0 : i32, i32
  }
  func.func @transform_7(%arg0: i32) -> (i32, i32) {
    %c0_i32 = arith.constant 0 : i32
    %c0_i32_0 = arith.constant 0 : i32
    %c0_i32_1 = arith.constant 0 : i32
    return %c0_i32, %c0_i32_0 : i32, i32
  }
  func.func @transform_8(%arg0: i32) -> (i32, i32) {
    %c0_i32 = arith.constant 0 : i32
    %c0_i32_0 = arith.constant 0 : i32
    return %arg0, %c0_i32 : i32, i32
  }
}

</mosaic_0001>

<bundles_post_ra>
// kernel: mlp_d_forward.1
= control target key start
LH: loop header
LB: loop body
LE: loop exit
PB: predicated region body
PF: predicated region fallthrough
CT: control target
= control target key end

     0   :  { %13 = vsyncpa [#allocation3], 0  ;;  %s515_s0 = inlined_call_operand.vmem [shape: f32[3], index: 0, kind: input, shape index: {}]   ;;  %s516_s1 = inlined_call_operand.vmem [shape: f32[8,16], index: 1, kind: input, shape index: {}]   ;;  %s517_s2 = inlined_call_operand.vmem [shape: f32[16,32], index: 2, kind: input, shape index: {}]   ;;  %s518_s3 = inlined_call_operand.vmem [shape: f32[1,32], index: 3, kind: input, shape index: {}]   ;;  %s519_s4 = inlined_call_operand.vmem [shape: f32[32,32], index: 4, kind: input, shape index: {}]   ;;  %s520_s5 = inlined_call_operand.vmem [shape: f32[1,32], index: 5, kind: input, shape index: {}]   ;;  %s521_s6 = inlined_call_operand.vmem [shape: f32[32,128], index: 6, kind: input, shape index: {}]   ;;  %s522_s7 = inlined_call_operand.vmem [shape: f32[1,128], index: 7, kind: input, shape index: {}]   ;;  %s523_s8 = inlined_call_operand.vmem [shape: f32[8,128], index: 8, kind: output, shape index: {}]  }
   0x1   :  { %s20_s29 = sshll.u32 %s515_s0, 4  ;;  %s21_s29 = int_to_ptr.vmem [resolvable:$true] %s20_s29 }
   0x2   :  { %s402_s30 = scalar_lea.vmem %s21_s29, 16  ;;  %p407_p1 = scmp.lt.s32.totalorder %s21_s29, %s21_s29 }
   0x3   :  { %p403_p0 = scmp.ne.s32.totalorder %s21_s29, %s402_s30  ;;  %p408_p2 = scmp.lt.s32.totalorder %s402_s30, %s402_s30 }
   0x5   :  { %p409_p3 = por %p408_p2, %p407_p1 }
   0x7   :  { %p410_p4 = pnand %p409_p3, %p403_p0 }
   0x9   :  { %413 = shalt.err (!%p410_p4)
}
   0xa   :  { %s416_s9 = smov [#allocation2]  }
   0xb   :  { %23 = dma.vmem_to_smem %s21_s29, 16, %s416_s9, [#allocation3]  }
   0xc   :  { %414 = dma.done.wait [#allocation3], 16  }
   0xd   :  { %415 = vsyncadd [#allocation3], 4294967280 }
   0xe   :  { %41 = sfence }
   0xf   :  { %v43_v0 = vld [vmem:[%s517_s2] sm:$0xff]  ;;  %v44_v1 = vld [vmem:[%s517_s2 + $0x8] sm:$0xff]  ;;  %v417_v2 = vmov 0.0|0.0   ;;  %vm418_vm0 = vmmov 0   ;;  %v419_v4 = vmov 0.0   ;;  %vm47_vm1 = vcmask 130048  }
  0x10   :  { %379 = vmatprep.subr.bf16.mxu0 %v417_v2  ;;  %v380_v3 = vpack.c.bf16 %v44_v1, %v43_v0  ;;  %354 = vmatprep.mubr.msk.f32.mxu0 %vm418_vm0, %v419_v4  ;;  %v42_v5 = vld [vmem:[%s516_s1] sm:$0xff]  ;;  %v138_v7 = vld [vmem:[%s519_s4 + $0x8] sm:$0xff]  ;;  %v139_v8 = vld [vmem:[%s519_s4 + $0x10] sm:$0xff]  ;;  %s46_s1 = sld [smem:[#allocation2]]  ;;  %vm143_vm2 = vcmask 261120   ;;  %s330_s30 = sld [smem:[#allocation2 + $0x1]] }
  0x11   :  { %382 = vmatprep.subr.bf16.mxu1 %v417_v2  ;;  %365 = vmatprep.mubr.msk.f32.mxu1 %vm418_vm0, %v419_v4  ;;  %v137_v6 = vld [vmem:[%s519_s4] sm:$0xff]  ;;  %v140_v10 = vld [vmem:[%s519_s4 + $0x18] sm:$0xff]  ;;  %v234_v25 = vld [vmem:[%s521_s6 + $0x8] sm:$0xff] }
  0x12   :  { %381 = vmatpush3.bf16.msra.mxu0 %v380_v3  ;;  %v383_v9 = vpack.c.bf16 %v138_v7, %v137_v6  ;;  %v386_v11 = vpack.c.bf16 %v140_v10, %v139_v8  ;;  %v328_v13 = vld [vmem:[%s518_s3] ss:$0 sm:$0xff]  ;;  %v235_v26 = vld [vmem:[%s521_s6 + $0x10] sm:$0xff]  ;;  %v236_v28 = vld [vmem:[%s521_s6 + $0x18] sm:$0xff] }
  0x13   :  { %388 = vmatprep.subr.bf16.mxu0 %v417_v2  ;;  %v233_v24 = vld [vmem:[%s521_s6] sm:$0xff]  ;;  %v392_v29 = vpack.c.bf16 %v236_v28, %v235_v26  ;;  %s334_s6 = sld [smem:[#allocation2 + $0x2]] }
  0x14   :  { %384 = vmatpush3.bf16.msra.mxu1 %v383_v9  ;;  %v389_v27 = vpack.c.bf16 %v234_v25, %v233_v24  ;;  %v332_v31 = vld [vmem:[%s520_s5] ss:$0 sm:$0xff] }
  0x15   :  { %355 = vmatmul.mubr.msk.f32.vlgmr.msra.gmra.mrb[0].mxu0 %vm47_vm1, %v42_v5  ;;  %385 = vmatprep.subr.bf16.mxu1 %v417_v2  ;;  %v336_v43 = vld [vmem:[%s522_s7] ss:$0 sm:$0xff] }
  0x16   :  { %376 = vmatprep.mubr.msk.f32.mxu0 %vm418_vm0, %v419_v4  ;;  %v121_v12 = vstv %s46_s1  ;;  %390 = vmatpush3.bf16.msra.mxu0 %v389_v27  ;;  %v217_v30 = vstv %s330_s30 }
  0x17   :  { %391 = vmatprep.subr.bf16.mxu0 %v417_v2 }
  0x18   :  { %387 = vmatpush3.bf16.msra.mxu1 %v386_v11 }
  0x19   :  { %v312_v42 = vstv %s334_s6 }
  0x1a   :  { %393 = vmatpush3.bf16.msra.mxu0 %v392_v29 }
  0xe8   :  { %v117_v14 = vpop.f32.mrb[0].mxu0 }
  0xe9   :  { %v122_v15 = vmul.f32 %v121_v12, %v117_v14  ;;  %v356_v16 = vpop.f32.mrb[1].mxu0 }
  0xeb   :  { %v129_v17 = vadd.f32 %v328_v13, %v122_v15 }
  0xed   :  { %v131_v18 = vmin.f32 %v129_v17, 0.0  ;;  %vm130_vm3 = vcmp.gt.f32.partialorder %v129_v17, 0.0 }
  0xef   :  { %v132_v19 = vmul.f32 1.442695, %v131_v18 }
  0xf1   :  { %398 = vpow2.f32 %v132_v19 }
  0xfb   :  { %v399_v20 = vpop.eup %398 }
  0xfc   :  { %v329_v21 = vadd.f32 -1.0, %v399_v20 }
  0xfe   :  { %v135_v22 = vmul.f32 0.2, %v329_v21 }
 0x100   :  { %v136_v23 = vsel %vm130_vm3, %v129_v17, %v135_v22 }
 0x101   :  { %366 = vmatmul.mubr.msk.f32.vlgmr.msra.gmra.mrb[0].mxu1 %vm143_vm2, %v136_v23 }
 0x1d4   :  { %v213_v32 = vpop.f32.mrb[0].mxu1 }
 0x1d5   :  { %v218_v33 = vmul.f32 %v217_v30, %v213_v32  ;;  %v367_v34 = vpop.f32.mrb[1].mxu1 }
 0x1d7   :  { %v225_v35 = vadd.f32 %v332_v31, %v218_v33 }
 0x1d9   :  { %v227_v36 = vmin.f32 %v225_v35, 0.0  ;;  %vm226_vm4 = vcmp.gt.f32.partialorder %v225_v35, 0.0 }
 0x1db   :  { %v228_v37 = vmul.f32 1.442695, %v227_v36 }
 0x1dd   :  { %400 = vpow2.f32 %v228_v37 }
 0x1e7   :  { %v401_v38 = vpop.eup %400 }
 0x1e8   :  { %v333_v39 = vadd.f32 -1.0, %v401_v38 }
 0x1ea   :  { %v231_v40 = vmul.f32 0.2, %v333_v39 }
 0x1ec   :  { %v232_v41 = vsel %vm226_vm4, %v225_v35, %v231_v40 }
 0x1ed   :  { %377 = vmatmul.mubr.msk.f32.vlgmr.msra.gmra.mrb[2].mxu0 %vm143_vm2, %v232_v41 }
 0x2c0   :  { %v308_v44 = vpop.f32.mrb[2].mxu0 }
 0x2c1   :  { %v313_v45 = vmul.f32 %v312_v42, %v308_v44  ;;  %v378_v46 = vpop.f32.mrb[3].mxu0 }
 0x2c3   :  { %v320_v47 = vadd.f32 %v336_v43, %v313_v45 }
 0x2c5   :  { %321 = vst [vmem:[%s523_s8] sm:$0xff] %v320_v47 }
 0x2c6   :  { %326 = vsyncpa [#allocation3], 1 }

</bundles_post_ra>
